<compile_context>
chip_gen: v7x
topology: tpu7x:2x2x1
jax: 0.10.0
libtpu: 0.0.40
codegen_flags: <defaults>
</compile_context>

<pallas_src>
import functools

import jax
import jax.numpy as jnp
from jax.experimental import pallas as pl
from jax.experimental.pallas import tpu as pltpu

EPS = 1e-5  # nn.InstanceNorm2d default (affine=False, no running stats, biased variance)

_ROLL_SIGN = None  # +1 if pltpu.roll(x, 1, axis=0) == jnp.roll(x, 1, axis=0), else -1


def _roll_sign():
    """Probe pltpu.roll's shift convention once (tiny kernel). Raises if neither convention holds."""
    global _ROLL_SIGN
    if _ROLL_SIGN is None:
        def _probe(x_ref, o_ref):
            o_ref[...] = pltpu.roll(x_ref[...], shift=1, axis=0)

        xp = jnp.arange(16 * 128, dtype=jnp.float32).reshape(16, 128)
        yp = pl.pallas_call(_probe, out_shape=jax.ShapeDtypeStruct((16, 128), jnp.float32))(xp)
        if bool(jnp.allclose(yp, jnp.roll(xp, 1, axis=0))):
            _ROLL_SIGN = 1
        elif bool(jnp.allclose(yp, jnp.roll(xp, -1, axis=0))):
            _ROLL_SIGN = -1
        else:
            raise RuntimeError("pltpu.roll probe matched neither convention")
    return _ROLL_SIGN


def _vmem_budget():
    """Per-core VMEM budget with headroom for compiler scratch (v7x has only 64 MiB/core)."""
    try:
        cap = int(pltpu.get_tpu_info().vmem_capacity_bytes)
    except Exception:
        cap = 64 << 20  # conservative (v7x-sized) default
    return min(96 << 20, int(0.75 * cap))


def _conv3x3_rows(slab_f32, w_ref, th, w_cols, concat_k, roll_sign):
    """3x3 'same' conv on flattened rows.

    slab_f32: ((th+2)*w_cols, C) f32 image rows [r-1 .. r+th] with the halo rows already zeroed at
    the image border.  Returns (th*w_cols, C) f32 conv output for rows r .. r+th-1.
    """
    rows, C = slab_f32.shape
    mdt = w_ref.dtype  # matmul operand dtype (bf16 fast path or f32 parity path)

    # W-axis neighbours via XLU roll; wrap-around at the left/right image edge is masked with a
    # lane-width-1 column index (broadcast inside jnp.where -> no full (rows, C) mask passes).
    col = jax.lax.broadcasted_iota(jnp.int32, (rows, 1), 0) % w_cols
    prev_ = pltpu.roll(slab_f32, shift=roll_sign % rows, axis=0)      # value at column w-1
    next_ = pltpu.roll(slab_f32, shift=(-roll_sign) % rows, axis=0)   # value at column w+1
    s_prev = jnp.where(col != 0, prev_, 0.0).astype(mdt)
    s_cent = slab_f32.astype(mdt)
    s_next = jnp.where(col != w_cols - 1, next_, 0.0).astype(mdt)

    n_out = th * w_cols
    if concat_k:
        # K = 3C contraction per kernel row: fills the 256-deep v6e/v7x MXU and keeps tap
        # accumulation in the MXU result buffer instead of 9 full-tile VPU adds.
        s_all = jnp.concatenate([s_prev, s_cent, s_next], axis=1)     # (rows, 3C), lane-aligned
        acc = jnp.dot(s_all[0:n_out], w_ref[0], preferred_element_type=jnp.float32)
        for dy in (1, 2):
            lo = dy * w_cols
            acc = acc + jnp.dot(s_all[lo:lo + n_out], w_ref[dy],
                                preferred_element_type=jnp.float32)
    else:
        # Per-tap K=C form: small C and v5e's 128-deep MXU (no concat staging stores).
        taps = (s_prev, s_cent, s_next)
        acc = jnp.dot(taps[0][0:n_out], w_ref[0], preferred_element_type=jnp.float32)
        for dy in range(3):
            lo = dy * w_cols
            hi = lo + n_out
            for dx in range(3):
                if dy == 0 and dx == 0:
                    continue
                acc = acc + jnp.dot(taps[dx][lo:hi], w_ref[3 * dy + dx],
                                    preferred_element_type=jnp.float32)
    return acc


# --------------------------- fused single-pass kernel (per image) ---------------------------

def _fused_kernel(x_ref, w_ref, o_ref, *, roll_sign, concat_k):
    """out = x + ReLU(InstanceNorm(conv3x3(x))) for one full image held in VMEM (no y HBM trip)."""
    _, H, W, C = x_ref.shape
    xf = x_ref[...].reshape(H * W, C).astype(jnp.float32)
    zrow = jnp.zeros((W, C), jnp.float32)
    slab = jnp.concatenate([zrow, xf, zrow], axis=0)                  # zero-padded H halo
    y = _conv3x3_rows(slab, w_ref, H, W, concat_k, roll_sign)          # (H*W, C) f32

    # InstanceNorm with centered (numerically robust) variance, all in VMEM / f32.
    inv_cnt = 1.0 / float(H * W)
    mean = jnp.sum(y, axis=0, keepdims=True) * inv_cnt                 # (1, C)
    d = y - mean
    var = jnp.sum(d * d, axis=0, keepdims=True) * inv_cnt
    inv_std = jax.lax.rsqrt(var + EPS)
    z = jnp.maximum(d * inv_std, 0.0)
    o_ref[...] = (xf + z).reshape(1, H, W, C).astype(o_ref.dtype)


# --------------------------- two-pass fallback (H-tiled) ---------------------------

def _conv_stats_kernel(xt_ref, xtop_ref, xbot_ref, w_ref, y_ref, st_ref, *, roll_sign, concat_k):
    """Pass 1: conv3x3 of one (TH, W, C) tile + per-tile [sum, sumsq] InstanceNorm partials."""
    t = pl.program_id(1)
    n_t = pl.num_programs(1)
    _, TH, W, C = xt_ref.shape

    # H halo rows come from clamped BlockSpec fetches; zero them at the image border.
    top_gate = jnp.where(t > 0, 1.0, 0.0).astype(jnp.float32)
    bot_gate = jnp.where(t < n_t - 1, 1.0, 0.0).astype(jnp.float32)
    top = xtop_ref[...].reshape(W, C).astype(jnp.float32) * top_gate
    bot = xbot_ref[...].reshape(W, C).astype(jnp.float32) * bot_gate
    mid = xt_ref[...].reshape(TH * W, C).astype(jnp.float32)
    slab = jnp.concatenate([top, mid, bot], axis=0)                    # ((TH+2)*W, C)

    acc = _conv3x3_rows(slab, w_ref, TH, W, concat_k, roll_sign)       # (TH*W, C) f32
    y_ref[...] = acc.reshape(1, TH, W, C).astype(y_ref.dtype)

    # InstanceNorm partials on the XLU (sublane reduce); MXU stays free for the conv.
    # TODO(synk): E[x^2]-E[x]^2 in f32 can cancel for large-mean activations; a per-tile-centered
    # (compensated) accumulation would be more robust for the tiled path.
    s1 = jnp.sum(acc, axis=0, keepdims=True)                           # (1, C)
    s2 = jnp.sum(acc * acc, axis=0, keepdims=True)                     # (1, C)
    st_ref[...] = jnp.concatenate([s1, s2], axis=0).reshape(1, 1, 2, C)


def _finalize_kernel(y_ref, x_ref, sb_ref, o_ref):
    """Pass 2: out = x + ReLU(y * scale + bias); scale = 1/std, bias = -mean/std per (n, c)."""
    sb = sb_ref[...]                 # (1, 2, C) f32
    scale = sb[:, 0:1, :]            # (1, 1, C)
    bias = sb[:, 1:2, :]
    z = jnp.maximum(y_ref[...].astype(jnp.float32) * scale + bias, 0.0)
    o_ref[...] = (x_ref[...].astype(jnp.float32) + z).astype(o_ref.dtype)


def _pick_tile_h(H, W, C, target_bytes):
    """Largest divisor of H whose f32 tile fits target_bytes; prefer >= 2 tiles (megacore)."""
    divs = [d for d in range(1, H + 1) if H % d == 0]
    fits = [d for d in divs if d * W * C * 4 <= target_bytes]
    if not fits:
        return 1
    multi = [d for d in fits if H // d >= 2]
    return max(multi) if multi else max(fits)


# --------------------------- wrappers ---------------------------

def resnet_block_nhwc(x_nhwc, weight_oihw, *, matmul_dtype=jnp.float32, tile_h=None, fuse=None):
    """out = x + ReLU(InstanceNorm2d(Conv3x3(x))). x: (N,H,W,C). weight: (Cout,Cin,3,3)."""
    N, H, W, C = x_nhwc.shape
    Cout, Cin, KH, KW = weight_oihw.shape
    assert (Cout, Cin, KH, KW) == (C, C, 3, 3), "ResnetBlock uses a 3x3 C->C conv"
    assert W % 8 == 0, "W must be a multiple of 8 for sublane-aligned tiles (pad W upstream)"
    # TODO(synk): pad C to a multiple of 128 upstream for fully lane-dense stores on small-C configs.

    mdt = jnp.dtype(matmul_dtype)
    concat_k = (C % 128 == 0)          # lane-aligned tap concat (K=3C) only for 128-multiple C
    sign = _roll_sign()
    budget = _vmem_budget()
    small_vmem = budget <= (56 << 20)  # v7x-class core (64 MiB VMEM)

    # (Cout,Cin,3,3) -> HWIO -> (9, Cin, Cout); concat-K form folds dx into the contraction dim.
    w_hwio = jnp.transpose(weight_oihw, (2, 3, 1, 0)).reshape(9, C, C).astype(mdt)
    w_kernel = w_hwio.reshape(3, 3 * C, C) if concat_k else w_hwio
    w_bytes = int(w_kernel.size) * mdt.itemsize

    xb = jnp.dtype(x_nhwc.dtype).itemsize
    img_f32 = H * W * C * 4

    if fuse is None:
        fused_est = 16 * img_f32 + 4 * H * W * C * xb + 2 * w_bytes   # generous working-set bound
        fuse = fused_est <= budget

    if fuse:
        # ---------------- fused single-pass path: no HBM round trip for the conv output ----------------
        cost = pl.CostEstimate(
            flops=(2 * 9 * C + 12) * N * H * W * C,
            transcendentals=N * C,
            bytes_accessed=2 * N * H * W * C * xb + N * w_bytes)
        return pl.pallas_call(
            functools.partial(_fused_kernel, roll_sign=sign, concat_k=concat_k),
            out_shape=jax.ShapeDtypeStruct((N, H, W, C), x_nhwc.dtype),
            grid_spec=pltpu.PrefetchScalarGridSpec(
                num_scalar_prefetch=0,
                grid=(N,),
                in_specs=[
                    pl.BlockSpec((1, H, W, C), lambda n: (n, 0, 0, 0)),
                    pl.BlockSpec(w_kernel.shape, lambda n: (0, 0, 0)),   # constant index: no re-DMA
                ],
                out_specs=pl.BlockSpec((1, H, W, C), lambda n: (n, 0, 0, 0)),
            ),
            compiler_params=pltpu.CompilerParams(
                dimension_semantics=("parallel",),
                vmem_limit_bytes=int(budget)),
            cost_estimate=cost,
        )(x_nhwc, w_kernel)

    # ---------------- two-pass fallback for large images ----------------
    t1 = (2 << 20) if small_vmem else (6 << 20)    # pass-1 f32 tile target (v7x-aware)
    t2 = (4 << 20) if small_vmem else (12 << 20)   # pass-2 tile target (pure streaming, decoupled)
    TH1 = tile_h if tile_h is not None else _pick_tile_h(H, W, C, t1)
    TH2 = tile_h if tile_h is not None else _pick_tile_h(H, W, C, t2)
    assert H % TH1 == 0 and H % TH2 == 0, "tile_h must divide H"
    HT1, HT2 = H // TH1, H // TH2

    # Store the conv intermediate in bf16 on the fast path (halves its HBM write+read traffic);
    # the norm stats are computed from the f32 accumulator in pass 1, so accuracy is preserved.
    y_dtype = jnp.float32 if mdt == jnp.dtype(jnp.float32) else jnp.bfloat16
    yb = jnp.dtype(y_dtype).itemsize

    cost1 = pl.CostEstimate(
        flops=2 * 9 * C * C * N * H * W + 8 * N * H * W * C,
        transcendentals=0,
        bytes_accessed=N * H * W * C * (xb + yb) + N * HT1 * 2 * W * C * xb
        + w_bytes + N * HT1 * 2 * C * 4)

    y, part = pl.pallas_call(
        functools.partial(_conv_stats_kernel, roll_sign=sign, concat_k=concat_k),
        out_shape=(
            jax.ShapeDtypeStruct((N, H, W, C), y_dtype),      # conv output
            jax.ShapeDtypeStruct((N, HT1, 2, C), jnp.float32),  # per-tile [sum, sumsq]
        ),
        grid_spec=pltpu.PrefetchScalarGridSpec(
            num_scalar_prefetch=0,
            grid=(N, HT1),
            in_specs=[
                pl.BlockSpec((1, TH1, W, C), lambda n, t: (n, t, 0, 0)),
                # one-row H halos: clamped at the border, zeroed in-kernel
                pl.BlockSpec((1, 1, W, C), lambda n, t: (n, jnp.maximum(t * TH1 - 1, 0), 0, 0)),
                pl.BlockSpec((1, 1, W, C), lambda n, t: (n, jnp.minimum(t * TH1 + TH1, H - 1), 0, 0)),
                pl.BlockSpec(w_kernel.shape, lambda n, t: (0, 0, 0)),
            ],
            out_specs=[
                pl.BlockSpec((1, TH1, W, C), lambda n, t: (n, t, 0, 0)),
                pl.BlockSpec((1, 1, 2, C), lambda n, t: (n, t, 0, 0)),
            ],
        ),
        compiler_params=pltpu.CompilerParams(
            dimension_semantics=("parallel", "parallel"),
            vmem_limit_bytes=int(budget)),
        cost_estimate=cost1,
    )(x_nhwc, x_nhwc, x_nhwc, w_kernel)

    # tiny per-(n, c) combine: partial sums -> scale/bias
    cnt = float(H * W)
    sums = jnp.sum(part, axis=1)                                  # (N, 2, C)
    mean = sums[:, 0, :] / cnt
    var = jnp.maximum(sums[:, 1, :] / cnt - mean * mean, 0.0)     # biased variance (PyTorch)
    inv_std = jax.lax.rsqrt(var + EPS)
    scale_bias = jnp.stack([inv_std, -mean * inv_std], axis=1).astype(jnp.float32)  # (N, 2, C)

    cost2 = pl.CostEstimate(
        flops=4 * N * H * W * C, transcendentals=0,
        bytes_accessed=N * H * W * C * (yb + 2 * xb) + N * 2 * C * 4)

    out = pl.pallas_call(
        _finalize_kernel,
        out_shape=jax.ShapeDtypeStruct((N, H, W, C), x_nhwc.dtype),
        grid_spec=pltpu.PrefetchScalarGridSpec(
            num_scalar_prefetch=0,
            grid=(N, HT2),
            in_specs=[
                pl.BlockSpec((1, TH2, W, C), lambda n, t: (n, t, 0, 0)),  # conv output y
                pl.BlockSpec((1, TH2, W, C), lambda n, t: (n, t, 0, 0)),  # residual x
                pl.BlockSpec((1, 2, C), lambda n, t: (n, 0, 0)),          # per-sample scale/bias
            ],
            out_specs=pl.BlockSpec((1, TH2, W, C), lambda n, t: (n, t, 0, 0)),
        ),
        compiler_params=pltpu.CompilerParams(
            dimension_semantics=("parallel", "parallel"),
            vmem_limit_bytes=int(budget)),
        cost_estimate=cost2,
    )(y, x_nhwc, scale_bias)
    return out


def resnet_block_nchw(x_nchw, weight_oihw, *, matmul_dtype=jnp.float32, tile_h=None, fuse=None):
    """PyTorch-layout adapter. Prefer resnet_block_nhwc and keep the surrounding model NHWC;
    these transposes are full HBM passes comparable in cost to the kernel itself."""
    x = jnp.transpose(x_nchw, (0, 2, 3, 1))
    out = resnet_block_nhwc(x, weight_oihw, matmul_dtype=matmul_dtype, tile_h=tile_h, fuse=fuse)
    return jnp.transpose(out, (0, 3, 1, 2))


def _reference_nchw(x_nchw, weight_oihw):
    """Plain-JAX reference: x + ReLU(InstanceNorm(Conv3x3(x))), full f32 precision."""
    y = jax.lax.conv_general_dilated(
        x_nchw, weight_oihw, window_strides=(1, 1), padding=((1, 1), (1, 1)),
        dimension_numbers=("NCHW", "OIHW", "NCHW"),
        precision=jax.lax.Precision.HIGHEST)
    mean = jnp.mean(y, axis=(2, 3), keepdims=True)
    var = jnp.mean((y - mean) ** 2, axis=(2, 3), keepdims=True)
    y = (y - mean) * jax.lax.rsqrt(var + EPS)
    return x_nchw + jnp.maximum(y, 0.0)


if __name__ == "__main__":
    key = jax.random.PRNGKey(0)
    kx, kw, kx2, kw2 = jax.random.split(key, 4)

    # --- small-channel config (conv_dim = 4, per the module's ctor) ---
    N, C, H, W = 2, 4, 16, 16
    x = jax.random.normal(kx, (N, C, H, W), dtype=jnp.float32)
    weight = 0.1 * jax.random.normal(kw, (C, C, 3, 3), dtype=jnp.float32)  # no bias (norm != None)
    ref = _reference_nchw(x, weight)

    # Default path: fused single-pass kernel, f32 matmul operands (strict PyTorch parity).
    out = jax.block_until_ready(resnet_block_nchw(x, weight))
    assert out.shape == (N, C, H, W)
    assert jnp.allclose(out, ref, atol=1e-3, rtol=1e-3), "fused f32 kernel mismatch vs reference"

    # Two-pass fallback (forced), f32.
    out2 = jax.block_until_ready(resnet_block_nchw(x, weight, fuse=False))
    assert jnp.allclose(out2, ref, atol=1e-3, rtol=1e-3), "two-pass f32 kernel mismatch vs reference"

    # Two-pass fallback, opt-in bf16 MXU fast path (bf16 y intermediate, f32 accumulation/norm).
    out3 = jax.block_until_ready(resnet_block_nchw(x, weight, fuse=False, matmul_dtype=jnp.bfloat16))
    assert jnp.allclose(out3, ref, atol=5e-2, rtol=5e-2), "two-pass bf16 kernel mismatch vs reference"

    # --- lane-aligned config (C = 128) exercises the concat-K (K = 3C) MXU path ---
    N2, C2, H2, W2 = 1, 128, 8, 8
    x2 = jax.random.normal(kx2, (N2, C2, H2, W2), dtype=jnp.float32)
    weight2 = 0.05 * jax.random.normal(kw2, (C2, C2, 3, 3), dtype=jnp.float32)
    ref2 = _reference_nchw(x2, weight2)

    out4 = jax.block_until_ready(resnet_block_nchw(x2, weight2))                 # fused, f32, K=3C
    assert jnp.allclose(out4, ref2, atol=1e-3, rtol=1e-3), "concat-K f32 kernel mismatch"

    out5 = jax.block_until_ready(resnet_block_nchw(x2, weight2, matmul_dtype=jnp.bfloat16))
    assert jnp.allclose(out5, ref2, atol=5e-2, rtol=5e-2), "concat-K bf16 kernel mismatch"

    print("KERNEL_OK")
</pallas_src>

<mosaic_0001>
module attributes {stable_mosaic.version = 11 : i64} {
  func.func @_probe(%arg0: memref<16x128xf32, #tpu.memory_space<vmem>>, %arg1: memref<16x128xf32, #tpu.memory_space<vmem>>) attributes {dimension_semantics = [], scalar_prefetch = 0 : i64, scratch_operands = 0 : i64, tpu.core_type = #tpu.core_type<tc>} {
    %c0 = arith.constant 0 : index
    %c0_0 = arith.constant 0 : index
    %0 = vector.load %arg0[%c0, %c0_0] : memref<16x128xf32, #tpu.memory_space<vmem>>, vector<16x128xf32>
    %c1_i32 = arith.constant 1 : i32
    %1 = tpu.dynamic_rotate %0 by %c1_i32 dim 0 : vector<16x128xf32>, i32 -> vector<16x128xf32>
    %c0_1 = arith.constant 0 : index
    %c0_2 = arith.constant 0 : index
    %2 = vector.load %arg1[%c0_1, %c0_2] : memref<16x128xf32, #tpu.memory_space<vmem>>, vector<16x128xf32>
    tpu.vector_store %arg1[%c0_1, %c0_2], %1 {strides = array<i32>} : memref<16x128xf32, #tpu.memory_space<vmem>>, vector<16x128xf32>,
    return
  }
}

</mosaic_0001>

<bundles_post_ra>
// kernel: tpu_custom_call.1
= control target key start
LH: loop header
LB: loop body
LE: loop exit
PB: predicated region body
PF: predicated region fallthrough
CT: control target
= control target key end

     0   :  { %6 = vsyncpa [#allocation3], 0  ;;  %s147_s0 = inlined_call_operand.hbm [shape: f32[16,128], index: 0, kind: input, shape index: {}]   ;;  %s148_s1 = inlined_call_operand.hbm [shape: f32[16,128], index: 1, kind: output, shape index: {}]  }
   0x1   :  { %7 = vsyncpa [#allocation4], 0  ;;  %s103_s6 = smov [#allocation2]   ;;  %s55_s10 = scalar_lea.hbm %s147_s0, 256 }
   0x2   :  { %s13_s7 = sshll.u32 %s103_s6, 4  ;;  %p56_p0 = scmp.ne.s32.totalorder %s147_s0, %s55_s10  ;;  %s14_s7 = int_to_ptr.vmem [resolvable:$true] %s13_s7 }
   0x3   :  { %p59_p1 = scmp.lt.u32.totalorder %s55_s10, %s147_s0 }
   0x5   :  { %p61_p2 = pnand %p59_p1, %p56_p0 }
   0x7   :  { %64 = shalt.err (!%p61_p2)
}
   0x8   :  { %s65_s15 = scalar_lea.vmem %s14_s7, 256  ;;  %p70_p4 = scmp.lt.s32.totalorder %s14_s7, %s14_s7 }
   0x9   :  { %p66_p3 = scmp.ne.s32.totalorder %s14_s7, %s65_s15  ;;  %p71_p5 = scmp.lt.s32.totalorder %s65_s15, %s65_s15 }
   0xb   :  { %p72_p6 = por %p71_p5, %p70_p4 }
   0xd   :  { %p73_p7 = pnand %p72_p6, %p66_p3 }
   0xf   :  { %76 = shalt.err (!%p73_p7)
}
  0x10   :  { %s104_s16 = smov 128   ;;  %s105_s17 = smov 8  }
  0x11   :  { %19 = dma.hbm_to_vmem [thread:$0]  %s147_s0, 256, %s14_s7, [#allocation3], %s104_s16, %s104_s16, %s105_s17  }
  0x12   :  { %99 = dma.done.wait [#allocation3], 256  }
  0x13   :  { %100 = vsyncadd [#allocation3], 4294967040  ;;  %v27_v0 = vlaneseq  ;;  %s106_s20 = smov [#allocation5]   ;;  %v23_v2 = vld [vmem:[#allocation2] sm:$0xff]  ;;  %v24_v3 = vld [vmem:[#allocation2 + $0x8] sm:$0xff] }
  0x14   :  { %s39_s21 = sshll.u32 %s106_s20, 4  ;;  %v25_v4 = vrot.slane %v23_v2, 7  ;;  %v26_v5 = vrot.slane %v24_v3, 7  ;;  %s40_s21 = int_to_ptr.vmem [resolvable:$true] %s39_s21 }
  0x15   :  { %v28_v1 = vshrl.u32 %v27_v0, 7  ;;  %s77_s22 = scalar_lea.vmem %s40_s21, 256  ;;  %p82_p9 = scmp.lt.s32.totalorder %s40_s21, %s40_s21 }
  0x16   :  { %p78_p8 = scmp.ne.s32.totalorder %s40_s21, %s77_s22  ;;  %p83_p10 = scmp.lt.s32.totalorder %s77_s22, %s77_s22 }
  0x17   :  { %vm29_vm0 = vcmp.lt.s32.totalorder %v28_v1, 1 }
  0x18   :  { %v31_v6 = vsel %vm29_vm0, %v26_v5, %v25_v4  ;;  %v30_v7 = vsel %vm29_vm0, %v25_v4, %v26_v5  ;;  %p84_p11 = por %p83_p10, %p82_p9 }
  0x19   :  { %32 = vst [vmem:[#allocation5] sm:$0xff] %v31_v6  ;;  %33 = vst [vmem:[#allocation5 + $0x8] sm:$0xff] %v30_v7 }
  0x1a   :  { %p85_p12 = pnand %p84_p11, %p78_p8 }
  0x1c   :  { %88 = shalt.err (!%p85_p12)
}
  0x1d   :  { %s89_s24 = scalar_lea.hbm %s148_s1, 256 }
  0x1e   :  { %p90_p13 = scmp.ne.s32.totalorder %s148_s1, %s89_s24  ;;  %p93_p0 = scmp.lt.u32.totalorder %s89_s24, %s148_s1 }
  0x20   :  { %p95_p1 = pnand %p93_p0, %p90_p13 }
  0x22   :  { %98 = shalt.err (!%p95_p1)
}
  0x23   :  { %45 = dma.vmem_to_hbm [thread:$0]  %s40_s21, 256, %s148_s1, [#allocation4], %s104_s16, %s104_s16, %s105_s17  }
  0x24   :  { %101 = dma.done.wait [#allocation4], 256  }
  0x25   :  { %102 = vsyncadd [#allocation4], 4294967040 }
  0x26   :  { %49 = vsyncpa [#allocation3], 1 }
  0x27   :  { %50 = vsyncpa [#allocation4], 1 }

</bundles_post_ra>
